<compile_context>
chip_gen: v6e
topology: v6e:2x2x1
jax: 0.10.0
libtpu: 0.0.40
codegen_flags: <defaults>
</compile_context>

<pallas_src>
import math

import jax
import jax.numpy as jnp
from jax import lax
from jax.experimental import pallas as pl
from jax.experimental.pallas import tpu as pltpu


_INV_SQRT2 = 1.0 / math.sqrt(2.0)


def _gelu(x, approximate):
    if approximate:
        # tanh approximation: lands on the EUP (own issue slot) instead of the
        # VALU erf polynomial.  Off by default to preserve nn.GELU() numerics.
        return jax.nn.gelu(x, approximate=True)
    # nn.GELU() default = exact erf GELU (evaluated in f32).
    return 0.5 * x * (1.0 + lax.erf(x * _INV_SQRT2))


def _make_ff_kernel(inner, chunk, approximate):
    n_chunks = inner // chunk

    def kernel(x_ref, w1_ref, w2_ref, o_ref):
        # x_ref: (tm, D), w1_ref: (D, inner), w2_ref: (inner, D), o_ref: (tm, D)
        x = x_ref[...]
        acc = jnp.zeros(o_ref.shape, jnp.float32)
        # Fully-unrolled chunk loop over the inner dim -> one basic block, so the
        # LLO scheduler interleaves GELU of chunk i with the MXU matmuls of
        # neighbouring chunks.  Slices are static and 128-lane aligned (chunk is
        # a multiple of 128), so they are zero-cost ref views.
        for c in range(n_chunks):
            lo = c * chunk
            h = jnp.dot(x, w1_ref[:, lo:lo + chunk],
                        preferred_element_type=jnp.float32)
            h = _gelu(h, approximate)
            # dropout p=0.0 and post_act_ln=False (Identity) are no-ops.
            acc = acc + jnp.dot(h.astype(w2_ref.dtype),
                                w2_ref[lo:lo + chunk, :],
                                preferred_element_type=jnp.float32)
        o_ref[...] = acc.astype(o_ref.dtype)

    return kernel


def _round_up(n, m):
    return ((n + m - 1) // m) * m


def _vmem_capacity_bytes():
    try:
        return int(pltpu.get_tpu_info().vmem_capacity_bytes)
    except Exception:
        return 64 << 20   # conservative default: v7x per-TensorCore VMEM


def _pick_inner_chunk(inner):
    for c in (512, 256, 128):
        if inner % c == 0:
            return c
    return inner          # fall back to unchunked for odd hidden sizes


def _pick_tm(M, D, inner, chunk, x_itemsize, w_itemsize, vmem_budget):
    """Largest row tile that fits the VMEM budget; prefer one that divides M
    (no wrapper pad/slice) and leaves >= 2 grid steps (so the 'parallel' M axis
    can shard across both TensorCores on v7x)."""
    weight_bytes = 2 * 2 * D * inner * w_itemsize   # both weights, double-buffered

    def tile_bytes(t):
        return (2 * t * D * x_itemsize      # x tile, double-buffered
                + 2 * t * D * x_itemsize    # out tile, double-buffered
                + t * D * 4                 # f32 accumulator
                + 2 * t * chunk * 4)        # f32 intermediate chunks in flight

    if M < 128:
        tm = _round_up(M, 8)                # (8,128) sublane rule
        return tm, weight_bytes + tile_bytes(tm)

    candidates = [t for t in (1024, 512, 256, 128)
                  if weight_bytes + tile_bytes(t) <= vmem_budget]
    if not candidates:
        candidates = [128]
    for cond in (lambda t: M % t == 0 and M // t >= 2,   # divisor + megacore
                 lambda t: M % t == 0,                   # divisor
                 lambda t: True):                        # largest feasible
        for t in candidates:
            if cond(t):
                return t, weight_bytes + tile_bytes(t)


def feedforward(x, w1, w2, *, approximate_gelu=False):
    """Fused FeedForward: y = GELU(x @ W1) @ W2.

    x: (B, T, D); w1: (D, inner); w2: (inner, D) -> (B, T, D).
    """
    B, T, D = x.shape
    inner = w1.shape[1]
    M = B * T

    chunk = _pick_inner_chunk(inner)
    x_itemsize = jnp.dtype(x.dtype).itemsize
    w_itemsize = jnp.dtype(w1.dtype).itemsize

    # ~25% headroom under physical per-core VMEM for Mosaic internal scratch.
    vmem_budget = (_vmem_capacity_bytes() * 3) // 4
    tm, working_set = _pick_tm(M, D, inner, chunk, x_itemsize, w_itemsize,
                               vmem_budget)
    vmem_limit = int(min(vmem_budget, max(working_set + (4 << 20), 32 << 20)))

    Mp = _round_up(M, tm)
    x2 = x.reshape(M, D)
    if Mp != M:
        # Only hit when no candidate tile divides M; padded rows are discarded.
        x2 = jnp.pad(x2, ((0, Mp - M), (0, 0)))

    kernel = _make_ff_kernel(inner, chunk, approximate_gelu)
    cost = pl.CostEstimate(
        flops=4 * M * D * inner,                   # two matmuls, 2 flops/MAC
        transcendentals=M * inner,                 # one erf/tanh per hidden elem
        bytes_accessed=(2 * M * D * x_itemsize     # x in + y out
                        + 2 * D * inner * w_itemsize))

    out = pl.pallas_call(
        kernel,
        out_shape=jax.ShapeDtypeStruct((Mp, D), x.dtype),
        grid_spec=pltpu.PrefetchScalarGridSpec(
            num_scalar_prefetch=0,
            grid=(Mp // tm,),
            in_specs=[
                pl.BlockSpec((tm, D), lambda i: (i, 0)),
                # Grid-invariant weights: index_map is constant, so Pallas DMAs
                # them once and keeps them VMEM-resident across the row grid.
                pl.BlockSpec((D, inner), lambda i: (0, 0)),
                pl.BlockSpec((inner, D), lambda i: (0, 0)),
            ],
            out_specs=pl.BlockSpec((tm, D), lambda i: (i, 0)),
        ),
        compiler_params=pltpu.CompilerParams(
            dimension_semantics=("parallel",),
            vmem_limit_bytes=vmem_limit),
        cost_estimate=cost,
    )(x2, w1, w2)

    if Mp != M:
        out = out[:M]
    return out.reshape(B, T, D)


if __name__ == "__main__":
    # Small shapes consistent with the module: dim=128, mult=4 -> inner=512.
    B, T, D, MULT = 2, 8, 128, 4
    INNER = D * MULT

    key = jax.random.PRNGKey(0)
    kx, k1, k2 = jax.random.split(key, 3)

    # bf16 operands feed the MXU at full rate; accumulation stays f32.
    x = jax.random.normal(kx, (B, T, D), dtype=jnp.float32).astype(jnp.bfloat16)
    w1 = (jax.random.normal(k1, (D, INNER), dtype=jnp.float32)
          * (1.0 / math.sqrt(D))).astype(jnp.bfloat16)
    w2 = (jax.random.normal(k2, (INNER, D), dtype=jnp.float32)
          * (1.0 / math.sqrt(INNER))).astype(jnp.bfloat16)

    y = feedforward(x, w1, w2)
    jax.block_until_ready(y)

    # Reference in plain JAX: f32 math on the same bf16 inputs, with the same
    # bf16 re-quantization of the intermediate before the second matmul.
    xf, w1f, w2f = (a.astype(jnp.float32) for a in (x, w1, w2))
    h = jnp.einsum("btd,de->bte", xf, w1f)
    h = 0.5 * h * (1.0 + lax.erf(h / math.sqrt(2.0)))
    h = h.astype(jnp.bfloat16).astype(jnp.float32)
    ref = jnp.einsum("bte,ed->btd", h, w2f)

    assert jnp.allclose(y.astype(jnp.float32), ref, atol=3e-2, rtol=3e-2), \
        "mismatch vs reference"

    print("KERNEL_OK")
</pallas_src>

<mosaic_0001>
module attributes {stable_mosaic.version = 11 : i64} {
  func.func @kernel(%arg0: i32, %arg1: memref<16x128xbf16, #tpu.memory_space<vmem>>, %arg2: memref<128x512xbf16, #tpu.memory_space<vmem>>, %arg3: memref<512x128xbf16, #tpu.memory_space<vmem>>, %arg4: memref<16x128xbf16, #tpu.memory_space<vmem>>) attributes {dimension_semantics = [#tpu.dimension_semantics<parallel>], iteration_bounds = array<i64: 1>, scalar_prefetch = 0 : i64, scratch_operands = 0 : i64, tpu.core_type = #tpu.core_type<tc>, window_params = [{transform_indices = @transform_0, window_bounds = array<i64: 16, 128>}, {pipeline_mode = #tpu.pipeline_mode<synchronous>, transform_indices = @transform_1, window_bounds = array<i64: 128, 512>}, {pipeline_mode = #tpu.pipeline_mode<synchronous>, transform_indices = @transform_2, window_bounds = array<i64: 512, 128>}, {transform_indices = @transform_3, window_bounds = array<i64: 16, 128>}]} {
    %c0 = arith.constant 0 : index
    %c0_0 = arith.constant 0 : index
    %0 = vector.load %arg1[%c0, %c0_0] : memref<16x128xbf16, #tpu.memory_space<vmem>>, vector<16x128xbf16>
    %cst = arith.constant 0.000000e+00 : f32
    %1 = vector.broadcast %cst : f32 to vector<16x128xf32>
    %c0_1 = arith.constant 0 : index
    %c0_2 = arith.constant 0 : index
    %2 = vector.load %arg2[%c0_1, %c0_2] : memref<128x512xbf16, #tpu.memory_space<vmem>>, vector<128x512xbf16>
    %cst_3 = arith.constant dense<0.000000e+00> : vector<16x512xf32>
    %3 = tpu.matmul %0, %2, %cst_3 {dimension_numbers = #tpu.dot_dimension_numbers<[1], [0], [0], [1], [0, 0, 1, 1], [], []>} : vector<16x128xbf16>, vector<128x512xbf16>, vector<16x512xf32> -> vector<16x512xf32>
    %cst_4 = arith.constant 5.000000e-01 : f32
    %4 = vector.broadcast %cst_4 : f32 to vector<16x512xf32>
    %5 = arith.mulf %4, %3 : vector<16x512xf32>
    %cst_5 = arith.constant 0.707106769 : f32
    %6 = vector.broadcast %cst_5 : f32 to vector<16x512xf32>
    %7 = arith.mulf %3, %6 : vector<16x512xf32>
    %8 = math.erf %7 : vector<16x512xf32>
    %cst_6 = arith.constant 1.000000e+00 : f32
    %9 = vector.broadcast %cst_6 : f32 to vector<16x512xf32>
    %10 = arith.addf %9, %8 : vector<16x512xf32>
    %11 = arith.mulf %5, %10 : vector<16x512xf32>
    %12 = arith.truncf %11 : vector<16x512xf32> to vector<16x512xbf16>
    %c0_7 = arith.constant 0 : index
    %c0_8 = arith.constant 0 : index
    %13 = vector.load %arg3[%c0_7, %c0_8] : memref<512x128xbf16, #tpu.memory_space<vmem>>, vector<512x128xbf16>
    %cst_9 = arith.constant dense<0.000000e+00> : vector<16x128xf32>
    %14 = tpu.matmul %12, %13, %cst_9 {dimension_numbers = #tpu.dot_dimension_numbers<[1], [0], [0], [1], [0, 0, 1, 1], [], []>} : vector<16x512xbf16>, vector<512x128xbf16>, vector<16x128xf32> -> vector<16x128xf32>
    %15 = arith.addf %1, %14 : vector<16x128xf32>
    %16 = arith.truncf %15 : vector<16x128xf32> to vector<16x128xbf16>
    %c0_10 = arith.constant 0 : index
    %c0_11 = arith.constant 0 : index
    %17 = vector.load %arg4[%c0_10, %c0_11] : memref<16x128xbf16, #tpu.memory_space<vmem>>, vector<16x128xbf16>
    tpu.vector_store %arg4[%c0_10, %c0_11], %16 {strides = array<i32>} : memref<16x128xbf16, #tpu.memory_space<vmem>>, vector<16x128xbf16>,
    return
  }
  func.func @transform_0(%arg0: i32) -> (i32, i32) {
    %c0_i32 = arith.constant 0 : i32
    %c0_i32_0 = arith.constant 0 : i32
    return %arg0, %c0_i32 : i32, i32
  }
  func.func @transform_1(%arg0: i32) -> (i32, i32) {
    %c0_i32 = arith.constant 0 : i32
    %c0_i32_0 = arith.constant 0 : i32
    %c0_i32_1 = arith.constant 0 : i32
    return %c0_i32, %c0_i32_0 : i32, i32
  }
  func.func @transform_2(%arg0: i32) -> (i32, i32) {
    %c0_i32 = arith.constant 0 : i32
    %c0_i32_0 = arith.constant 0 : i32
    %c0_i32_1 = arith.constant 0 : i32
    return %c0_i32, %c0_i32_0 : i32, i32
  }
  func.func @transform_3(%arg0: i32) -> (i32, i32) {
    %c0_i32 = arith.constant 0 : i32
    %c0_i32_0 = arith.constant 0 : i32
    return %arg0, %c0_i32 : i32, i32
  }
}

</mosaic_0001>

<bundles_post_ra>
// kernel: tpu_custom_call.1
= control target key start
LH: loop header
LB: loop body
LE: loop exit
PB: predicated region body
PF: predicated region fallthrough
CT: control target
= control target key end

     0   :  { %8 = vsyncpa [#allocation3], 0  ;;  %s1113_s0 = inlined_call_operand.hbm [shape: bf16[16,128], index: 0, kind: input, shape index: {}]   ;;  %s1114_s1 = inlined_call_operand.hbm [shape: bf16[128,512], index: 1, kind: input, shape index: {}]   ;;  %s1115_s2 = inlined_call_operand.hbm [shape: bf16[512,128], index: 2, kind: input, shape index: {}]   ;;  %s1116_s3 = inlined_call_operand.hbm [shape: bf16[16,128], index: 3, kind: output, shape index: {}]  }
   0x1   :  { %9 = vsyncpa [#allocation6], 0 }
   0x2   :  { %10 = vsyncpa [#allocation4], 0  ;;  %s1063_s12 = smov [#allocation5]  }
   0x3   :  { %s28_s13 = sshll.u32 %s1063_s12, 4  ;;  %s29_s13 = int_to_ptr.vmem [resolvable:$true] %s28_s13 }
   0x4   :  { %s985_s14 = scalar_lea.vmem %s29_s13, 4096  ;;  %p990_p1 = scmp.lt.s32.totalorder %s29_s13, %s29_s13 }
   0x5   :  { %p986_p0 = scmp.ne.s32.totalorder %s29_s13, %s985_s14  ;;  %p991_p2 = scmp.lt.s32.totalorder %s985_s14, %s985_s14 }
   0x7   :  { %p992_p3 = por %p991_p2, %p990_p1 }
   0x9   :  { %p993_p4 = pnand %p992_p3, %p986_p0 }
   0xb   :  { %996 = shalt.err (!%p993_p4)
}
   0xc   :  { %s1064_s15 = smov 256   ;;  %s1065_s16 = smov 16  }
   0xd   :  { %34 = dma.hbm_to_vmem [thread:$0]  %s1114_s1, 4096, %s29_s13, [#allocation6], %s1064_s15, %s1064_s15, %s1065_s16  }
   0xe   :  { %s1066_s19 = smov [#allocation2]  }
   0xf   :  { %s16_s20 = sshll.u32 %s1066_s19, 4  ;;  %s17_s20 = int_to_ptr.vmem [resolvable:$true] %s16_s20 }
  0x10   :  { %s1005_s21 = scalar_lea.vmem %s17_s20, 128  ;;  %p1010_p6 = scmp.lt.s32.totalorder %s17_s20, %s17_s20 }
  0x11   :  { %p1006_p5 = scmp.ne.s32.totalorder %s17_s20, %s1005_s21  ;;  %p1011_p7 = scmp.lt.s32.totalorder %s1005_s21, %s1005_s21 }
  0x13   :  { %p1012_p8 = por %p1011_p7, %p1010_p6 }
  0x15   :  { %p1013_p9 = pnand %p1012_p8, %p1006_p5 }
  0x17   :  { %1016 = shalt.err (!%p1013_p9)
}
  0x18   :  { %s1067_s22 = smov 64   ;;  %s1068_s23 = smov 4  }
  0x19   :  { %22 = dma.hbm_to_vmem [thread:$0]  %s1113_s0, 128, %s17_s20, [#allocation3], %s1067_s22, %s1067_s22, %s1068_s23  }
  0x1a   :  { %s1069_s1 = smov [#allocation7]  }
  0x1b   :  { %s40_s26 = sshll.u32 %s1069_s1, 4  ;;  %s41_s26 = int_to_ptr.vmem [resolvable:$true] %s40_s26 }
  0x1c   :  { %s1025_s27 = scalar_lea.vmem %s41_s26, 4096  ;;  %p1030_p11 = scmp.lt.s32.totalorder %s41_s26, %s41_s26 }
  0x1d   :  { %p1026_p10 = scmp.ne.s32.totalorder %s41_s26, %s1025_s27  ;;  %p1031_p12 = scmp.lt.s32.totalorder %s1025_s27, %s1025_s27 }
  0x1f   :  { %p1032_p13 = por %p1031_p12, %p1030_p11 }
  0x21   :  { %p1033_p0 = pnand %p1032_p13, %p1026_p10 }
  0x23   :  { %1036 = shalt.err (!%p1033_p0)
}
  0x24   :  { %46 = dma.hbm_to_vmem [thread:$0]  %s1115_s2, 4096, %s41_s26, [#allocation6], %s1067_s22, %s1067_s22, %s1068_s23  }
  0x25   :  { %1057 = dma.done.wait [#allocation3], 128  }
  0x26   :  { %1058 = vsyncadd [#allocation3], 4294967168 }
  0x27   :  { %1059 = dma.done.wait [#allocation6], 8192  }
  0x28   :  { %1060 = vsyncadd [#allocation6], 4294959104  ;;  %v1070_v0 = vmov 0   ;;  %v880_v1 = vld [vmem:[#allocation5 + $0xe4] ss:$16 sps:$4 sm:$0xff]   ;;  %v929_v33 = vld [vmem:[#allocation7 + $0x78] sm:$0xff]  }
  0x29   :  { %289 = vmatprep.mubr.bf16.mxu0 %v1070_v0  ;;  %332 = vmatprep.mubr.bf16.mxu1 %v1070_v0  ;;  %v882_v2 = vld [vmem:[#allocation5 + $0xec] ss:$16 sps:$4 sm:$0xff]   ;;  %v884_v3 = vld [vmem:[#allocation5 + $0xe0] ss:$16 sps:$4 sm:$0xff]   ;;  %v885_v4 = vld [vmem:[#allocation5 + $0xe8] ss:$16 sps:$4 sm:$0xff]  }
  0x2a   :  { %257 = vmatprep.subr.bf16.mxu0 %v880_v1  ;;  %300 = vmatprep.subr.bf16.mxu1 %v882_v2  ;;  %v886_v5 = vld [vmem:[#allocation5 + $0xc4] ss:$16 sps:$4 sm:$0xff]   ;;  %v888_v6 = vld [vmem:[#allocation5 + $0xcc] ss:$16 sps:$4 sm:$0xff]   ;;  %v890_v7 = vld [vmem:[#allocation5 + $0xc0] ss:$16 sps:$4 sm:$0xff]  }
  0x2b   :  { %258 = vmatpush1.bf16.msra.mxu0 %v884_v3  ;;  %301 = vmatpush1.bf16.msra.mxu1 %v885_v4  ;;  %v891_v8 = vld [vmem:[#allocation5 + $0xc8] ss:$16 sps:$4 sm:$0xff]   ;;  %v892_v9 = vld [vmem:[#allocation5 + $0xa4] ss:$16 sps:$4 sm:$0xff]   ;;  %v894_v10 = vld [vmem:[#allocation5 + $0xac] ss:$16 sps:$4 sm:$0xff]  }
  0x2c   :  { %259 = vmatprep.subr.bf16.mxu0 %v886_v5  ;;  %302 = vmatprep.subr.bf16.mxu1 %v888_v6  ;;  %v896_v11 = vld [vmem:[#allocation5 + $0xa0] ss:$16 sps:$4 sm:$0xff]   ;;  %v897_v12 = vld [vmem:[#allocation5 + $0xa8] ss:$16 sps:$4 sm:$0xff]   ;;  %v898_v13 = vld [vmem:[#allocation5 + $0x84] ss:$16 sps:$4 sm:$0xff]  }
  0x2d   :  { %v900_v14 = vld [vmem:[#allocation5 + $0x8c] ss:$16 sps:$4 sm:$0xff]   ;;  %v902_v15 = vld [vmem:[#allocation5 + $0x80] ss:$16 sps:$4 sm:$0xff]   ;;  %v903_v16 = vld [vmem:[#allocation5 + $0x88] ss:$16 sps:$4 sm:$0xff]  }
  0x2e   :  { %v904_v17 = vld [vmem:[#allocation5 + $0x64] ss:$16 sps:$4 sm:$0xff]   ;;  %v906_v18 = vld [vmem:[#allocation5 + $0x6c] ss:$16 sps:$4 sm:$0xff]   ;;  %v908_v19 = vld [vmem:[#allocation5 + $0x60] ss:$16 sps:$4 sm:$0xff]  }
  0x2f   :  { %260 = vmatpush1.bf16.msra.mxu0 %v890_v7  ;;  %303 = vmatpush1.bf16.msra.mxu1 %v891_v8  ;;  %v909_v20 = vld [vmem:[#allocation5 + $0x68] ss:$16 sps:$4 sm:$0xff]   ;;  %v910_v21 = vld [vmem:[#allocation5 + $0x44] ss:$16 sps:$4 sm:$0xff]   ;;  %v912_v22 = vld [vmem:[#allocation5 + $0x4c] ss:$16 sps:$4 sm:$0xff]  }
  0x30   :  { %261 = vmatprep.subr.bf16.mxu0 %v892_v9  ;;  %304 = vmatprep.subr.bf16.mxu1 %v894_v10  ;;  %v914_v23 = vld [vmem:[#allocation5 + $0x40] ss:$16 sps:$4 sm:$0xff]   ;;  %v915_v24 = vld [vmem:[#allocation5 + $0x48] ss:$16 sps:$4 sm:$0xff]   ;;  %v916_v25 = vld [vmem:[#allocation5 + $0x24] ss:$16 sps:$4 sm:$0xff]  }
  0x31   :  { %v918_v26 = vld [vmem:[#allocation5 + $0x2c] ss:$16 sps:$4 sm:$0xff]   ;;  %v920_v27 = vld [vmem:[#allocation5 + $0x20] ss:$16 sps:$4 sm:$0xff]   ;;  %v921_v28 = vld [vmem:[#allocation5 + $0x28] ss:$16 sps:$4 sm:$0xff]  }
  0x32   :  { %v922_v29 = vld [vmem:[#allocation5 + $0x4] ss:$16 sps:$4 sm:$0xff]   ;;  %v924_v30 = vld [vmem:[#allocation5 + $0xc] ss:$16 sps:$4 sm:$0xff]   ;;  %v926_v31 = vld [vmem:[#allocation5] ss:$16 sps:$4 sm:$0xff]  }
  0x33   :  { %262 = vmatpush1.bf16.msra.mxu0 %v896_v11  ;;  %305 = vmatpush1.bf16.msra.mxu1 %v897_v12  ;;  %v927_v32 = vld [vmem:[#allocation5 + $0x8] ss:$16 sps:$4 sm:$0xff]   ;;  %v933_v38 = vld [vmem:[#allocation7 + $0x70] sm:$0xff]   ;;  %v941_v46 = vld [vmem:[#allocation7 + $0x60] sm:$0xff]   ;;  %s1071_s0 = smov [#allocation8]  }
  0x34   :  { %263 = vmatprep.subr.bf16.mxu0 %v898_v13  ;;  %306 = vmatprep.subr.bf16.mxu1 %v900_v14  ;;  %v930_v34 = vld [vmem:[#allocation7 + $0xf8] sm:$0xff]   ;;  %v934_v39 = vld [vmem:[#allocation7 + $0xf0] sm:$0xff]   ;;  %v937_v42 = vld [vmem:[#allocation7 + $0x68] sm:$0xff]   ;;  %s740_s2 = sshll.u32 %s1071_s0, 4  ;;  %s741_s2 = int_to_ptr.vmem [resolvable:$true] %s740_s2 }
  0x35   :  { %v928_v35 = vld [vmem:[#allocation2] sm:$0xff]   ;;  %v935_v40 = vld [vmem:[#allocation7 + $0x30] sm:$0xff]   ;;  %v938_v43 = vld [vmem:[#allocation7 + $0xe8] sm:$0xff]   ;;  %s1037_s30 = scalar_lea.vmem %s741_s2, 128  ;;  %p1042_p2 = scmp.lt.s32.totalorder %s741_s2, %s741_s2 }
  0x36   :  { %v931_v36 = vld [vmem:[#allocation7 + $0x38] sm:$0xff]   ;;  %v936_v41 = vld [vmem:[#allocation7 + $0xb0] sm:$0xff]   ;;  %v939_v44 = vld [vmem:[#allocation7 + $0x28] sm:$0xff]   ;;  %p1038_p1 = scmp.ne.s32.totalorder %s741_s2, %s1037_s30  ;;  %p1043_p3 = scmp.lt.s32.totalorder %s1037_s30, %s1037_s30 }
  0x37   :  { %264 = vmatpush1.bf16.msra.mxu0 %v902_v15  ;;  %307 = vmatpush1.bf16.msra.mxu1 %v903_v16  ;;  %v932_v37 = vld [vmem:[#allocation7 + $0xb8] sm:$0xff]   ;;  %v940_v45 = vld [vmem:[#allocation7 + $0xa8] sm:$0xff]   ;;  %v942_v47 = vld [vmem:[#allocation7 + $0xe0] sm:$0xff]  }
  0x38   :  { %265 = vmatprep.subr.bf16.mxu0 %v904_v17  ;;  %308 = vmatprep.subr.bf16.mxu1 %v906_v18  ;;  %v943_v48 = vld [vmem:[#allocation7 + $0x20] sm:$0xff]   ;;  %v945_v50 = vld [vmem:[#allocation7 + $0x58] sm:$0xff]   ;;  %v949_v54 = vld [vmem:[#allocation7 + $0x50] sm:$0xff]   ;;  %p1044_p4 = por %p1043_p3, %p1042_p2 }
  0x39   :  { %v944_v49 = vld [vmem:[#allocation7 + $0xa0] sm:$0xff]   ;;  %v946_v51 = vld [vmem:[#allocation7 + $0xd8] sm:$0xff]   ;;  %v950_v55 = vld [vmem:[#allocation7 + $0xd0] sm:$0xff]  }
  0x3a   :  { %v947_v52 = vld [vmem:[#allocation7 + $0x18] sm:$0xff]   ;;  %v951_v56 = vld [vmem:[#allocation7 + $0x10] sm:$0xff]   ;;  %v953_v58 = vld [vmem:[#allocation7 + $0x48] sm:$0xff]   ;;  %p1045_p5 = pnand %p1044_p4, %p1038_p1 }
  0x3b   :  { %266 = vmatpush1.bf16.msra.mxu0 %v908_v19  ;;  %309 = vmatpush1.bf16.msra.mxu1 %v909_v20  ;;  %v948_v53 = vld [vmem:[#allocation7 + $0x98] sm:$0xff]   ;;  %v952_v57 = vld [vmem:[#allocation7 + $0x90] sm:$0xff]   ;;  %v954_v59 = vld [vmem:[#allocation7 + $0xc8] sm:$0xff]  }
  0x3c   :  { %267 = vmatprep.subr.bf16.mxu0 %v910_v21  ;;  %310 = vmatprep.subr.bf16.mxu1 %v912_v22  ;;  %v955_v60 = vld [vmem:[#allocation7 + $0x8] sm:$0xff]   ;;  %v957_v62 = vld [vmem:[#allocation7 + $0x40] sm:$0xff]  }
  0x3d   :  { %v956_v61 = vld [vmem:[#allocation7 + $0x88] sm:$0xff]   ;;  %v958_v63 = vld [vmem:[#allocation7 + $0xc0] sm:$0xff]  }
  0x3e   :  { %v959_v0 = vld [vmem:[#allocation7] sm:$0xff]  }
  0x3f   :  { %268 = vmatpush1.bf16.msra.mxu0 %v914_v23  ;;  %311 = vmatpush1.bf16.msra.mxu1 %v915_v24  ;;  %v960_v1 = vld [vmem:[#allocation7 + $0x80] sm:$0xff]  }
  0x40   :  { %269 = vmatprep.subr.bf16.mxu0 %v916_v25  ;;  %312 = vmatprep.subr.bf16.mxu1 %v918_v26 }
  0x43   :  { %270 = vmatpush1.bf16.msra.mxu0 %v920_v27  ;;  %313 = vmatpush1.bf16.msra.mxu1 %v921_v28 }
  0x44   :  { %271 = vmatprep.subr.bf16.mxu0 %v922_v29  ;;  %314 = vmatprep.subr.bf16.mxu1 %v924_v30 }
  0x47   :  { %272 = vmatpush1.bf16.msra.mxu0 %v926_v31  ;;  %315 = vmatpush1.bf16.msra.mxu1 %v927_v32 }
  0x48   :  { %827 = vmatprep.subr.bf16.mxu0 %v929_v33  ;;  %849 = vmatprep.subr.bf16.mxu1 %v930_v34 }
  0x4a   :  { %290 = vmatmul.mubr.bf16.vlgmr.msra.gmra.mxu0 %v928_v35  ;;  %333 = vmatmul.mubr.bf16.vlgmr.msra.gmra.mxu1 %v928_v35 }
  0x4b   :  { %828 = vmatpush3.bf16.msra.mxu0 %v931_v36  ;;  %850 = vmatpush3.bf16.msra.mxu1 %v932_v37 }
  0x4c   :  { %829 = vmatprep.subr.bf16.mxu0 %v933_v38  ;;  %851 = vmatprep.subr.bf16.mxu1 %v934_v39 }
  0x4f   :  { %830 = vmatpush3.bf16.msra.mxu0 %v935_v40  ;;  %852 = vmatpush3.bf16.msra.mxu1 %v936_v41 }
  0x50   :  { %831 = vmatprep.subr.bf16.mxu0 %v937_v42  ;;  %853 = vmatprep.subr.bf16.mxu1 %v938_v43 }
  0x53   :  { %832 = vmatpush3.bf16.msra.mxu0 %v939_v44  ;;  %854 = vmatpush3.bf16.msra.mxu1 %v940_v45 }
  0x54   :  { %833 = vmatprep.subr.bf16.mxu0 %v941_v46  ;;  %855 = vmatprep.subr.bf16.mxu1 %v942_v47 }
  0x57   :  { %834 = vmatpush3.bf16.msra.mxu0 %v943_v48  ;;  %856 = vmatpush3.bf16.msra.mxu1 %v944_v49 }
  0x58   :  { %835 = vmatprep.subr.bf16.mxu0 %v945_v50  ;;  %857 = vmatprep.subr.bf16.mxu1 %v946_v51 }
  0x5b   :  { %836 = vmatpush3.bf16.msra.mxu0 %v947_v52  ;;  %858 = vmatpush3.bf16.msra.mxu1 %v948_v53 }
  0x5c   :  { %837 = vmatprep.subr.bf16.mxu0 %v949_v54  ;;  %859 = vmatprep.subr.bf16.mxu1 %v950_v55 }
  0x5f   :  { %838 = vmatpush3.bf16.msra.mxu0 %v951_v56  ;;  %860 = vmatpush3.bf16.msra.mxu1 %v952_v57 }
  0x60   :  { %839 = vmatprep.subr.bf16.mxu0 %v953_v58  ;;  %861 = vmatprep.subr.bf16.mxu1 %v954_v59 }
  0x63   :  { %840 = vmatpush3.bf16.msra.mxu0 %v955_v60  ;;  %862 = vmatpush3.bf16.msra.mxu1 %v956_v61 }
  0x64   :  { %841 = vmatprep.subr.bf16.mxu0 %v957_v62  ;;  %863 = vmatprep.subr.bf16.mxu1 %v958_v63 }
  0x67   :  { %842 = vmatpush3.bf16.msra.mxu0 %v959_v0  ;;  %864 = vmatpush3.bf16.msra.mxu1 %v960_v1 }
 0x10a   :  { %v291_v2 = vpop.f32.mrf.mxu0  ;;  %v334_v3 = vpop.f32.mrf.mxu1 }
 0x10b   :  { %v351_v4 = vmul.f32 0.70710677, %v291_v2  ;;  %v353_v5 = vmul.f32 0.70710677, %v334_v3  ;;  %v343_v24 = vmul.f32 0.5, %v291_v2  ;;  %v345_v42 = vmul.f32 0.5, %v334_v3 }
 0x10c   :  { %v293_v6 = vpop.f32.mrf.mxu0  ;;  %v336_v7 = vpop.f32.mrf.mxu1 }
 0x10d   :  { %961 = verf.f32 %v351_v4  ;;  %v352_v8 = vmul.f32 0.70710677, %v293_v6  ;;  %v354_v9 = vmul.f32 0.70710677, %v336_v7  ;;  %v344_v25 = vmul.f32 0.5, %v293_v6 }
 0x10e   :  { %963 = verf.f32 %v353_v5  ;;  %v295_v10 = vpop.f32.mrf.mxu0  ;;  %v338_v11 = vpop.f32.mrf.mxu1  ;;  %v346_v38 = vmul.f32 0.5, %v336_v7 }
 0x10f   :  { %965 = verf.f32 %v352_v8  ;;  %v355_v12 = vmul.f32 0.70710677, %v295_v10  ;;  %v357_v13 = vmul.f32 0.70710677, %v338_v11  ;;  %v347_v31 = vmul.f32 0.5, %v295_v10 }
 0x110   :  { %967 = verf.f32 %v354_v9  ;;  %v297_v14 = vpop.f32.mrf.mxu0  ;;  %v340_v15 = vpop.f32.mrf.mxu1  ;;  %v349_v35 = vmul.f32 0.5, %v338_v11 }
 0x111   :  { %969 = verf.f32 %v355_v12  ;;  %v356_v16 = vmul.f32 0.70710677, %v297_v14  ;;  %v358_v17 = vmul.f32 0.70710677, %v340_v15  ;;  %v348_v36 = vmul.f32 0.5, %v297_v14 }
 0x112   :  { %971 = verf.f32 %v357_v13  ;;  %v350_v40 = vmul.f32 0.5, %v340_v15 }
 0x113   :  { %973 = verf.f32 %v356_v16 }
 0x114   :  { %975 = verf.f32 %v358_v17 }
 0x11a   :  { %v962_v18 = vpop.eup %961 }
 0x11b   :  { %v964_v19 = vpop.eup %963  ;;  %v367_v29 = vadd.f32 1.0, %v962_v18 }
 0x11c   :  { %v966_v20 = vpop.eup %965  ;;  %v369_v34 = vadd.f32 1.0, %v964_v19 }
 0x11d   :  { %v968_v21 = vpop.eup %967  ;;  %v368_v26 = vadd.f32 1.0, %v966_v20  ;;  %v375_v46 = vmul.f32 %v367_v29, %v343_v24 }
 0x11e   :  { %v970_v22 = vpop.eup %969  ;;  %v370_v30 = vadd.f32 1.0, %v968_v21  ;;  %v377_v49 = vmul.f32 %v369_v34, %v345_v42 }
 0x11f   :  { %v972_v23 = vpop.eup %971  ;;  %v371_v27 = vadd.f32 1.0, %v970_v22  ;;  %v376_v43 = vmul.f32 %v368_v26, %v344_v25 }
 0x120   :  { %v974_v28 = vpop.eup %973  ;;  %v373_v32 = vadd.f32 1.0, %v972_v23  ;;  %v378_v47 = vmul.f32 %v370_v30, %v346_v38 }
 0x121   :  { %v976_v33 = vpop.eup %975  ;;  %v372_v37 = vadd.f32 1.0, %v974_v28  ;;  %v379_v39 = vmul.f32 %v371_v27, %v347_v31 }
 0x122   :  { %v374_v41 = vadd.f32 1.0, %v976_v33  ;;  %v381_v44 = vmul.f32 %v373_v32, %v349_v35 }
 0x123   :  { %v380_v45 = vmul.f32 %v372_v37, %v348_v36  ;;  %v383_v51 = vpack.c.bf16 %v379_v39, %v375_v46 }
 0x124   :  { %v382_v48 = vmul.f32 %v374_v41, %v350_v40  ;;  %v385_v53 = vpack.c.bf16 %v381_v44, %v377_v49 }
 0x125   :  { %v384_v50 = vpack.c.bf16 %v380_v45, %v376_v43 }
 0x126   :  { %v386_v52 = vpack.c.bf16 %v382_v48, %v378_v47 }
 0x127   :  { %675 = vmatprep.mubr.bf16.mxu0 %v384_v50 }
 0x128   :  { %716 = vmatprep.mubr.bf16.mxu1 %v386_v52  ;;  %676 = vmatmul.mubr.bf16.vlgmr.msra.gmra.mxu0 %v383_v51 }
 0x129   :  { %717 = vmatmul.mubr.bf16.vlgmr.msra.gmra.mxu1 %v385_v53 }
 0x1e8   :  { %v843_v54 = vpop.f32.mrf.mxu0 }
 0x1e9   :  { %v865_v55 = vpop.f32.mrf.mxu1 }
 0x1ea   :  { %v844_v56 = vpop.f32.mrf.mxu0 }
 0x1eb   :  { %v866_v57 = vpop.f32.mrf.mxu1  ;;  %v845_v60 = vadd.f32 %v844_v56, %v843_v54 }
 0x1ec   :  { %v846_v58 = vpop.f32.mrf.mxu0  ;;  %v867_v61 = vadd.f32 %v866_v57, %v865_v55 }
 0x1ed   :  { %v868_v59 = vpop.f32.mrf.mxu1 }
 0x1ee   :  { %v847_v62 = vpop.f32.mrf.mxu0  ;;  %v719_v2 = vadd.f32 %v867_v61, %v845_v60 }
 0x1ef   :  { %v848_v63 = vadd.f32 %v847_v62, %v846_v58  ;;  %v869_v0 = vpop.f32.mrf.mxu1 }
 0x1f0   :  { %v870_v1 = vadd.f32 %v869_v0, %v868_v59 }
 0x1f2   :  { %v722_v3 = vadd.f32 %v870_v1, %v848_v63 }
 0x1f4   :  { %v825_v4 = vpack.c.bf16 %v722_v3, %v719_v2 }
 0x1f6   :  { %826 = vst [vmem:[#allocation8] sm:$0xff] %v825_v4  }
 0x1f7   :  { %1048 = shalt.err (!%p1045_p5)
}
 0x1f8   :  { %746 = dma.vmem_to_hbm [thread:$0]  %s741_s2, 128, %s1116_s3, [#allocation4], %s1067_s22, %s1067_s22, %s1068_s23  }
 0x1f9   :  { %1061 = dma.done.wait [#allocation4], 128  }
 0x1fa   :  { %1062 = vsyncadd [#allocation4], 4294967168 }
 0x1fb   :  { %750 = vsyncpa [#allocation3], 1 }
 0x1fc   :  { %751 = vsyncpa [#allocation6], 1 }
 0x1fd   :  { %752 = vsyncpa [#allocation4], 1 }

</bundles_post_ra>
